<compile_context>
chip_gen: v7x
topology: tpu7x:2x2x1
jax: 0.10.0
libtpu: 0.0.40
codegen_flags: <defaults>
</compile_context>

<pallas_src>
import jax
import jax.numpy as jnp
from jax.experimental import pallas as pl
from jax.experimental.pallas import tpu as pltpu


def logistic_regression_kernel(x_ref, w_ref, b_ref, o_ref):
    # x_ref: (TB, F) VMEM (streamed), w_ref: (1, F) VMEM (resident),
    # b_ref: (1,) SMEM scalar, o_ref: (TB, 1) VMEM.
    x = x_ref[...].astype(jnp.float32)          # upcast in-register -> f32 accumulate
    w = w_ref[...].astype(jnp.float32)          # (1, F), broadcasts over rows
    b = b_ref[0]                                # scalar bias from SMEM
    # VPU multiply + lane reduction instead of an N=1 MXU matmul.
    logits = jnp.sum(x * w, axis=-1, keepdims=True) + b   # (TB, 1) f32
    o_ref[...] = jax.nn.sigmoid(logits).astype(o_ref.dtype)


def _round_up(v, m):
    return ((v + m - 1) // m) * m


_TARGET_X_BLOCK_BYTES = 2 * 1024 * 1024   # aim for ~2 MiB of x per grid step
_VMEM_X_BUDGET_BYTES = 40 * 1024 * 1024   # budget for double-buffered x (fits v7x 64 MiB)


def _choose_row_tile(B, F, itemsize):
    # Rows per step so an x block is ~2 MiB (amortizes ~0.35 us per-step overhead).
    tb = _TARGET_X_BLOCK_BYTES // max(1, itemsize * F)
    tb = min(max(tb, 256), 8192)
    # VMEM budget: two in-flight (tb, F) buffers must fit comfortably on every chip.
    tb_vmem_cap = _VMEM_X_BUDGET_BYTES // max(1, 2 * itemsize * F)
    tb = min(tb, max(16, tb_vmem_cap))
    # Give v7x's two TensorCores at least 2 grid steps on large batches.
    if B >= 1024:
        tb = min(tb, _round_up(pl.cdiv(B, 2), 16))
    return _round_up(max(tb, 16), 16)


def logistic_regression(x, weight, bias, *, tb=None):
    """x: (B, F), weight: (1, F), bias: (1,)  ->  (B, 1) f32 probabilities."""
    B, F = x.shape
    w = weight.reshape(1, F).astype(jnp.float32)   # tiny; keep f32 and VMEM-resident
    b = bias.reshape(1).astype(jnp.float32)        # scalar bias for SMEM

    itemsize = jnp.dtype(x.dtype).itemsize
    if tb is None:
        tb = _choose_row_tile(B, F, itemsize)

    if B <= tb:
        TB = B                                   # block == full dim -> always legal
    else:
        TB = _round_up(tb, 16)                   # sublane/bf16-tile aligned

    grid = (pl.cdiv(B, TB),)                     # ragged last tile: OOB stores masked

    # Working-set-derived VMEM request (double-buffered x / w / out + headroom).
    vmem_need = 2 * (TB * F * itemsize + F * 4 + TB * 4) + (2 << 20)
    vmem_limit = int(min(max(vmem_need, 4 << 20), 64 << 20))

    # TODO(synk): for extremely wide F (TB pinned at 16 still over the VMEM budget),
    # add an "arbitrary" F-reduction grid axis with a (TB, 1) f32 accumulator scratch.

    return pl.pallas_call(
        logistic_regression_kernel,
        out_shape=jax.ShapeDtypeStruct((B, 1), jnp.float32),
        grid_spec=pltpu.PrefetchScalarGridSpec(
            num_scalar_prefetch=0,
            grid=grid,
            in_specs=[
                # x: stream row tiles across the grid (native dtype, upcast in-kernel).
                pl.BlockSpec((TB, F), lambda i: (i, 0)),
                # weight: same block every step -> stays resident in VMEM.
                pl.BlockSpec((1, F), lambda i: (0, 0)),
                # bias: single scalar in SMEM.
                pl.BlockSpec(memory_space=pltpu.MemorySpace.SMEM),
            ],
            out_specs=pl.BlockSpec((TB, 1), lambda i: (i, 0)),
        ),
        compiler_params=pltpu.CompilerParams(
            # Batch tiles are independent -> megacore-shardable on v7x.
            dimension_semantics=("parallel",),
            vmem_limit_bytes=vmem_limit,
        ),
    )(x, w, b)


if __name__ == "__main__":
    key = jax.random.PRNGKey(0)
    kx, kw, kb, kx2 = jax.random.split(key, 4)

    # Small shapes matching the PyTorch module's forward (batch of feature vectors).
    batch, n_features = 8, 32
    bound = 1.0 / (n_features ** 0.5)

    x = jax.random.normal(kx, (batch, n_features), dtype=jnp.float32)
    weight = jax.random.uniform(kw, (1, n_features), minval=-bound, maxval=bound,
                                dtype=jnp.float32)
    bias = jax.random.uniform(kb, (1,), minval=-bound, maxval=bound,
                              dtype=jnp.float32)

    y = logistic_regression(x, weight, bias)
    jax.block_until_ready(y)
    y_ref = jax.nn.sigmoid(x @ weight.T + bias)
    assert y.shape == (batch, 1)
    assert jnp.allclose(y, y_ref, atol=1e-5, rtol=1e-5)

    # Multi-step ragged path: B % TB != 0, no host-side pad/slice, masked last tile.
    B2, F2 = 1000, 128
    x2 = jax.random.normal(kx2, (B2, F2), dtype=jnp.float32)
    w2 = jax.random.uniform(kw, (1, F2), minval=-bound, maxval=bound, dtype=jnp.float32)
    y2 = logistic_regression(x2, w2, bias, tb=256)   # forces 4 grid steps, ragged last
    jax.block_until_ready(y2)
    y2_ref = jax.nn.sigmoid(x2 @ w2.T + bias)
    assert y2.shape == (B2, 1)
    assert jnp.allclose(y2, y2_ref, atol=1e-5, rtol=1e-5)

    # bf16 streaming path: half the HBM bytes for x, f32 math in-register.
    y3 = logistic_regression(x2.astype(jnp.bfloat16), w2, bias, tb=256)
    jax.block_until_ready(y3)
    assert jnp.allclose(y3, y2_ref, atol=2e-2, rtol=2e-2)

    print("KERNEL_OK")
</pallas_src>

<mosaic_0001>
module attributes {stable_mosaic.version = 11 : i64} {
  func.func @logistic_regression_kernel(%arg0: i32, %arg1: memref<8x32xf32, #tpu.memory_space<vmem>>, %arg2: memref<1x32xf32, #tpu.memory_space<vmem>>, %arg3: memref<1xf32, #tpu.memory_space<smem>>, %arg4: memref<8x1xf32, #tpu.memory_space<vmem>>) attributes {dimension_semantics = [#tpu.dimension_semantics<parallel>], iteration_bounds = array<i64: 1>, scalar_prefetch = 0 : i64, scratch_operands = 0 : i64, tpu.core_type = #tpu.core_type<tc>, window_params = [{transform_indices = @transform_0, window_bounds = array<i64: 8, 32>}, {pipeline_mode = #tpu.pipeline_mode<synchronous>, transform_indices = @transform_1, window_bounds = array<i64: 1, 32>}, {transform_indices = @transform_2, window_bounds = array<i64: 1>}, {transform_indices = @transform_3, window_bounds = array<i64: 8, 1>}]} {
    %c0 = arith.constant 0 : index
    %c0_0 = arith.constant 0 : index
    %0 = vector.load %arg1[%c0, %c0_0] : memref<8x32xf32, #tpu.memory_space<vmem>>, vector<8x32xf32>
    %c0_1 = arith.constant 0 : index
    %c0_2 = arith.constant 0 : index
    %1 = vector.load %arg2[%c0_1, %c0_2] : memref<1x32xf32, #tpu.memory_space<vmem>>, vector<1x32xf32>
    %c0_3 = arith.constant 0 : index
    %2 = memref.load %arg3[%c0_3] : memref<1xf32, #tpu.memory_space<smem>>
    %3 = vector.broadcast %1 : vector<1x32xf32> to vector<8x32xf32>
    %4 = arith.mulf %0, %3 : vector<8x32xf32>
    %cst = arith.constant dense<0.000000e+00> : vector<8xf32>
    %5 = vector.multi_reduction <add>, %4, %cst [1] : vector<8x32xf32> to vector<8xf32>
    %6 = vector.shape_cast %5 : vector<8xf32> to vector<8x1xf32>
    %7 = vector.broadcast %2 : f32 to vector<8x1xf32>
    %8 = arith.addf %6, %7 : vector<8x1xf32>
    %9 = arith.negf %8 : vector<8x1xf32>
    %10 = math.exp %9 : vector<8x1xf32>
    %cst_4 = arith.constant 1.000000e+00 : f32
    %11 = vector.broadcast %cst_4 : f32 to vector<8x1xf32>
    %12 = arith.addf %11, %10 : vector<8x1xf32>
    %13 = arith.divf %11, %12 : vector<8x1xf32>
    %c0_5 = arith.constant 0 : index
    %c0_6 = arith.constant 0 : index
    %14 = vector.load %arg4[%c0_5, %c0_6] : memref<8x1xf32, #tpu.memory_space<vmem>>, vector<8x1xf32>
    tpu.vector_store %arg4[%c0_5, %c0_6], %13 {strides = array<i32>} : memref<8x1xf32, #tpu.memory_space<vmem>>, vector<8x1xf32>,
    return
  }
  func.func @transform_0(%arg0: i32) -> (i32, i32) {
    %c0_i32 = arith.constant 0 : i32
    %c0_i32_0 = arith.constant 0 : i32
    return %arg0, %c0_i32 : i32, i32
  }
  func.func @transform_1(%arg0: i32) -> (i32, i32) {
    %c0_i32 = arith.constant 0 : i32
    %c0_i32_0 = arith.constant 0 : i32
    %c0_i32_1 = arith.constant 0 : i32
    return %c0_i32, %c0_i32_0 : i32, i32
  }
  func.func @transform_2(%arg0: i32) -> i32 {
    %c0_i32 = arith.constant 0 : i32
    %c0_i32_0 = arith.constant 0 : i32
    return %c0_i32 : i32
  }
  func.func @transform_3(%arg0: i32) -> (i32, i32) {
    %c0_i32 = arith.constant 0 : i32
    %c0_i32_0 = arith.constant 0 : i32
    return %arg0, %c0_i32 : i32, i32
  }
}

</mosaic_0001>

<bundles_post_ra>
// kernel: tpu_custom_call.1
= control target key start
LH: loop header
LB: loop body
LE: loop exit
PB: predicated region body
PF: predicated region fallthrough
CT: control target
= control target key end

     0   :  { %9 = vsyncpa [#allocation4], 0  ;;  %s87_s12 = smov [#allocation3]   ;;  %s129_s0 = inlined_call_operand.hbm [shape: f32[8,32], index: 0, kind: input, shape index: {}]   ;;  %s130_s1 = inlined_call_operand.vmem [shape: f32[1,32], index: 1, kind: input, shape index: {}]   ;;  %s131_s2 = inlined_call_operand.<no memory space> [shape: f32[1], index: 2, kind: input, shape index: {}]   ;;  %s132_s3 = inlined_call_operand.vmem [shape: f32[8,1], index: 3, kind: output, shape index: {}]  }
   0x1   :  { %s16_s13 = sshll.u32 %s87_s12, 4  ;;  %s63_s16 = scalar_lea.hbm %s129_s0, 128  ;;  %s17_s13 = int_to_ptr.vmem [resolvable:$true] %s16_s13 }
   0x2   :  { %p64_p0 = scmp.ne.s32.totalorder %s129_s0, %s63_s16  ;;  %p67_p1 = scmp.lt.u32.totalorder %s63_s16, %s129_s0 }
   0x4   :  { %p69_p2 = pnand %p67_p1, %p64_p0 }
   0x6   :  { %72 = shalt.err (!%p69_p2)
}
   0x7   :  { %s73_s21 = scalar_lea.vmem %s17_s13, 128  ;;  %p78_p4 = scmp.lt.s32.totalorder %s17_s13, %s17_s13 }
   0x8   :  { %p74_p3 = scmp.ne.s32.totalorder %s17_s13, %s73_s21  ;;  %p79_p5 = scmp.lt.s32.totalorder %s73_s21, %s73_s21 }
   0xa   :  { %p80_p6 = por %p79_p5, %p78_p4 }
   0xc   :  { %p81_p7 = pnand %p80_p6, %p74_p3 }
   0xe   :  { %84 = shalt.err (!%p81_p7)
}
   0xf   :  { %19 = dma.hbm_to_vmem [thread:$0]  %s129_s0, 128, %s17_s13, [#allocation4]  }
  0x10   :  { %85 = dma.done.wait [#allocation4], 128  }
  0x11   :  { %86 = vsyncadd [#allocation4], 4294967168  ;;  %v27_v0 = vld [vmem:[#allocation3] sm:$0xff]  ;;  %vm37_vm0 = vcmask 261120   ;;  %v41_v4 = vstv %s131_s2  ;;  %vm49_vm1 = vcmask 7168  }
  0x12   :  { %v56_v1 = vld [vmem:[%s130_s1] ss:$0 sm:$0xff] }
  0x13   :  { %v36_v2 = vmul.f32 %v56_v1, %v27_v0 }
  0x15   :  { %v38_v3 = vsel %vm37_vm0, %v36_v2, 0.0 }
  0x16   :  { %39 = vadd.xlane.f32.xlu0 %v38_v3 }
  0xa3   :  { %v40_v5 = vpop.xlane.xlu0 %39 }
  0xa4   :  { %v42_v6 = vadd.f32 %v41_v4, %v40_v5 }
  0xa6   :  { %v57_v7 = vmul.f32 -1.442695, %v42_v6 }
  0xa8   :  { %59 = vpow2.f32 %v57_v7 }
  0xb2   :  { %v60_v8 = vpop.eup %59 }
  0xb3   :  { %v46_v9 = vadd.f32 1.0, %v60_v8 }
  0xb5   :  { %61 = vrcp.f32 %v46_v9 }
  0xbf   :  { %v62_v10 = vpop.eup %61 }
  0xc0   :  { %50 = vst.msk [vmem:[%s132_s3] sm:$0xff] %vm49_vm1, %v62_v10 }
  0xc1   :  { %55 = vsyncpa [#allocation4], 1 }

</bundles_post_ra>
